<compile_context>
chip_gen: v7x
topology: tpu7x:2x2x1
jax: 0.10.0
libtpu: 0.0.40
codegen_flags: <defaults>
</compile_context>

<pallas_src>
import functools

import jax
import jax.numpy as jnp
from jax.experimental import pallas as pl
from jax.experimental.pallas import tpu as pltpu


def _spike_patch(block_shape, row0, y, x):
    """(tile_h, W) f32 tile: +0.5 inside the 3x3 spike patch, 0 elsewhere."""
    th, tw = block_shape
    rows = row0 + jax.lax.broadcasted_iota(jnp.int32, (th, 1), 0)
    cols = jax.lax.broadcasted_iota(jnp.int32, (1, tw), 1)
    rmask = (rows >= y) & (rows < y + 3)
    cmask = (cols >= x) & (cols < x + 3)
    return (rmask & cmask).astype(jnp.float32) * 0.5


def _make_kernel(noise_level, tile_h):
    nl = float(noise_level)  # plain Python float -> inlined literal, NOT a captured const

    def kernel(params_ref, img_ref, noise_ref, out_ref):
        # params_ref (SMEM, int32[3]): [apply_spike, y, x]
        v = img_ref[...] + noise_ref[...] * nl
        # Common (98%) path: one single store of the clamped result.
        out_ref[...] = jnp.clip(v, 0.0, 1.0)

        apply_spike = params_ref[0]
        y = params_ref[1]
        x = params_ref[2]

        row0 = pl.program_id(0) * tile_h
        # Spike path only if enabled AND this row-tile intersects rows [y, y+3).
        tile_hit = (apply_spike == 1) & (y < row0 + tile_h) & (y + 3 > row0)

        @pl.when(tile_hit)
        def _():
            spike = _spike_patch(out_ref.shape, row0, y, x)
            # Clamp AFTER the spike add, matching torch.clamp(img + noise, 0, 1).
            out_ref[...] = jnp.clip(v + spike, 0.0, 1.0)

    return kernel


def _pick_tile_h(H, W,
                 vmem_budget_bytes=12 * 1024 * 1024,
                 target_block_bytes=2 * 1024 * 1024):
    """Byte-targeted row tile (~2 MiB per f32 array), safe under every chip's scoped VMEM.

    3 f32 arrays (img, noise, out), each double-buffered by the BlockSpec pipeline.
    The 12 MiB budget fits v5e's 16 MiB scoped default and v7x's 32 MiB (64 MiB physical).
    """
    row_bytes = 4 * W
    max_rows_budget = max(vmem_budget_bytes // (3 * 2 * row_bytes), 1)
    target_rows = max(target_block_bytes // row_bytes, 1)
    t = min(H, target_rows, max_rows_budget)
    if t >= H:
        if H < 16:
            return H                      # tiny image: one full-array block (always legal)
        # Split into >=2 row tiles so the "parallel" axis can shard across v7x's two TCs.
        t = H // 2
    t = max(8, (t // 8) * 8)              # keep the sublane dim a multiple of 8
    # TODO(synk): for extremely wide W (where even 8-row, double-buffered blocks overflow
    # scoped VMEM) add a lane-axis tile (multiple of 128) as a second grid dimension.
    return t


@functools.partial(jax.jit, static_argnames=("noise_level", "tile_h"))
def noise_injection(img, params, noise, *, noise_level=0.05, tile_h=None):
    """img, noise: (H, W) float32; params: (3,) int32 = [apply_spike, y, x]."""
    H, W = img.shape
    if tile_h is None:
        tile_h = _pick_tile_h(H, W)
    grid = (pl.cdiv(H, tile_h),)

    return pl.pallas_call(
        _make_kernel(noise_level, tile_h),
        out_shape=jax.ShapeDtypeStruct((H, W), jnp.float32),
        grid=grid,
        in_specs=[
            pl.BlockSpec(memory_space=pltpu.MemorySpace.SMEM),   # scalar params
            pl.BlockSpec((tile_h, W), lambda i: (i, 0)),         # img row tile
            pl.BlockSpec((tile_h, W), lambda i: (i, 0)),         # noise row tile
        ],
        out_specs=pl.BlockSpec((tile_h, W), lambda i: (i, 0)),
        compiler_params=pltpu.CompilerParams(
            dimension_semantics=("parallel",)),
        cost_estimate=pl.CostEstimate(
            flops=4 * H * W, transcendentals=0, bytes_accessed=12 * H * W),
    )(params, img, noise)


# ---------------------------------------------------------------------------
# Hardware-PRNG variant (the preferred path on real TPUs): generates the normal
# field in-kernel, so only img is read and out is written (8 B/elem vs 12 B/elem)
# and no separate XLA pass materializes the noise in HBM.
# TODO(synk): pltpu.prng_seed / stateful_normal have no interpret/CPU lowering in this
# sandbox, so __main__ validates the streamed-noise kernel above; use this one on hardware.
# ---------------------------------------------------------------------------
def _make_prng_kernel(noise_level, tile_h):
    nl = float(noise_level)

    def kernel(params_ref, img_ref, out_ref):
        # params_ref (SMEM, int32[4]): [apply_spike, y, x, seed]
        # Seed per grid step so every row tile draws independent noise.
        pltpu.prng_seed(params_ref[3] + pl.program_id(0))
        noise = pltpu.stateful_normal(img_ref.shape, jnp.float32)
        v = img_ref[...] + noise * nl
        out_ref[...] = jnp.clip(v, 0.0, 1.0)

        apply_spike = params_ref[0]
        y = params_ref[1]
        x = params_ref[2]
        row0 = pl.program_id(0) * tile_h
        tile_hit = (apply_spike == 1) & (y < row0 + tile_h) & (y + 3 > row0)

        @pl.when(tile_hit)
        def _():
            spike = _spike_patch(out_ref.shape, row0, y, x)
            out_ref[...] = jnp.clip(v + spike, 0.0, 1.0)

    return kernel


@functools.partial(jax.jit, static_argnames=("noise_level", "tile_h"))
def noise_injection_prng(img, params, seed, *, noise_level=0.05, tile_h=None):
    H, W = img.shape
    if tile_h is None:
        tile_h = _pick_tile_h(H, W)
    grid = (pl.cdiv(H, tile_h),)
    params4 = jnp.concatenate(
        [params.astype(jnp.int32), jnp.asarray(seed, jnp.int32).reshape(1)])
    return pl.pallas_call(
        _make_prng_kernel(noise_level, tile_h),
        out_shape=jax.ShapeDtypeStruct((H, W), jnp.float32),
        grid=grid,
        in_specs=[
            pl.BlockSpec(memory_space=pltpu.MemorySpace.SMEM),
            pl.BlockSpec((tile_h, W), lambda i: (i, 0)),
        ],
        out_specs=pl.BlockSpec((tile_h, W), lambda i: (i, 0)),
        compiler_params=pltpu.CompilerParams(
            dimension_semantics=("parallel",)),
        cost_estimate=pl.CostEstimate(
            flops=4 * H * W, transcendentals=2 * H * W, bytes_accessed=8 * H * W),
    )(params4, img)


def make_params(key, h, w, spike_prob=0.02, force_spike=None):
    """On-device stand-in for the python `random` calls (no host syncs)."""
    k_u, k_y, k_x = jax.random.split(key, 3)
    if force_spike is None:
        apply_spike = (jax.random.uniform(k_u, ()) < spike_prob).astype(jnp.int32)
    else:
        apply_spike = jnp.int32(force_spike)
    y = jax.random.randint(k_y, (), 0, h, dtype=jnp.int32)   # == random.randint(0, h-1)
    x = jax.random.randint(k_x, (), 0, w, dtype=jnp.int32)   # == random.randint(0, w-1)
    return jnp.stack([apply_spike, y, x]).astype(jnp.int32)


def _reference(img, noise, params, noise_level=0.05):
    """Pure-JAX reference of the module's forward (given the same noise field)."""
    H, W = img.shape
    n = noise * jnp.float32(noise_level)
    apply_spike, y, x = params[0], params[1], params[2]
    rows = jnp.arange(H, dtype=jnp.int32)[:, None]
    cols = jnp.arange(W, dtype=jnp.int32)[None, :]
    mask = (rows >= y) & (rows < y + 3) & (cols >= x) & (cols < x + 3) & (apply_spike == 1)
    n = n + jnp.where(mask, 0.5, 0.0)
    return jnp.clip(img + n, 0.0, 1.0)


if __name__ == "__main__":
    key = jax.random.PRNGKey(0)
    k_img, k_noise, k_par = jax.random.split(key, 3)

    H, W = 64, 256
    img = jax.random.uniform(k_img, (H, W), dtype=jnp.float32)       # values in [0, 1)
    # Stand-in for torch.randn_like; on real TPU hardware use noise_injection_prng
    # (in-kernel PRNG, no streamed noise field).
    noise = jax.random.normal(k_noise, (H, W), dtype=jnp.float32)

    # Normal path (spike with prob 0.02 — almost always off); auto-picked tile (32 rows).
    params = make_params(k_par, H, W, spike_prob=0.02)
    out = jax.block_until_ready(noise_injection(img, params, noise, noise_level=0.05))

    # Forced-spike path, with the 3x3 patch straddling the 32-row tile boundary.
    params_spike = jnp.array([1, 30, 100], dtype=jnp.int32)
    out_spike = jax.block_until_ready(noise_injection(img, params_spike, noise,
                                                      noise_level=0.05, tile_h=32))

    assert out.shape == (H, W) and out.dtype == jnp.float32
    assert bool(jnp.all(out >= 0.0)) and bool(jnp.all(out <= 1.0))
    assert bool(jnp.all(out_spike >= 0.0)) and bool(jnp.all(out_spike <= 1.0))
    assert bool(jnp.allclose(out, _reference(img, noise, params), atol=1e-6))
    assert bool(jnp.allclose(out_spike, _reference(img, noise, params_spike), atol=1e-6))

    print("KERNEL_OK")
</pallas_src>

<mosaic_0001>
module attributes {stable_mosaic.version = 11 : i64} {
  func.func @kernel(%arg0: i32, %arg1: memref<3xi32, #tpu.memory_space<smem>>, %arg2: memref<32x256xf32, #tpu.memory_space<vmem>>, %arg3: memref<32x256xf32, #tpu.memory_space<vmem>>, %arg4: memref<32x256xf32, #tpu.memory_space<vmem>>) attributes {dimension_semantics = [#tpu.dimension_semantics<parallel>], iteration_bounds = array<i64: 2>, scalar_prefetch = 0 : i64, scratch_operands = 0 : i64, tpu.core_type = #tpu.core_type<tc>, window_params = [{transform_indices = @transform_0, window_bounds = array<i64: 3>}, {transform_indices = @transform_1, window_bounds = array<i64: 32, 256>}, {transform_indices = @transform_2, window_bounds = array<i64: 32, 256>}, {transform_indices = @transform_3, window_bounds = array<i64: 32, 256>}]} {
    %c0 = arith.constant 0 : index
    %c0_0 = arith.constant 0 : index
    %0 = vector.load %arg2[%c0, %c0_0] : memref<32x256xf32, #tpu.memory_space<vmem>>, vector<32x256xf32>
    %c0_1 = arith.constant 0 : index
    %c0_2 = arith.constant 0 : index
    %1 = vector.load %arg3[%c0_1, %c0_2] : memref<32x256xf32, #tpu.memory_space<vmem>>, vector<32x256xf32>
    %cst = arith.constant 5.000000e-02 : f32
    %2 = vector.broadcast %cst : f32 to vector<32x256xf32>
    %3 = arith.mulf %1, %2 : vector<32x256xf32>
    %4 = arith.addf %0, %3 : vector<32x256xf32>
    %cst_3 = arith.constant 0.000000e+00 : f32
    %cst_4 = arith.constant 1.000000e+00 : f32
    %5 = vector.broadcast %cst_3 : f32 to vector<32x256xf32>
    %6 = arith.maximumf %5, %4 : vector<32x256xf32>
    %7 = vector.broadcast %cst_4 : f32 to vector<32x256xf32>
    %8 = arith.minimumf %7, %6 : vector<32x256xf32>
    %c0_5 = arith.constant 0 : index
    %c0_6 = arith.constant 0 : index
    %9 = vector.load %arg4[%c0_5, %c0_6] : memref<32x256xf32, #tpu.memory_space<vmem>>, vector<32x256xf32>
    tpu.vector_store %arg4[%c0_5, %c0_6], %8 {strides = array<i32>} : memref<32x256xf32, #tpu.memory_space<vmem>>, vector<32x256xf32>,
    %c0_7 = arith.constant 0 : index
    %10 = memref.load %arg1[%c0_7] : memref<3xi32, #tpu.memory_space<smem>>
    %c1 = arith.constant 1 : index
    %11 = memref.load %arg1[%c1] : memref<3xi32, #tpu.memory_space<smem>>
    %c2 = arith.constant 2 : index
    %12 = memref.load %arg1[%c2] : memref<3xi32, #tpu.memory_space<smem>>
    %c32_i32 = arith.constant 32 : i32
    %13 = arith.muli %arg0, %c32_i32 : i32
    %c1_i32 = arith.constant 1 : i32
    %14 = arith.cmpi eq, %10, %c1_i32 : i32
    %c32_i32_8 = arith.constant 32 : i32
    %15 = arith.addi %13, %c32_i32_8 : i32
    %16 = arith.cmpi slt, %11, %15 : i32
    %17 = arith.andi %14, %16 : i1
    %c3_i32 = arith.constant 3 : i32
    %18 = arith.addi %11, %c3_i32 : i32
    %19 = arith.cmpi sgt, %18, %13 : i32
    %20 = arith.andi %17, %19 : i1
    %21 = arith.extui %20 : i1 to i32
    %c0_i32 = arith.constant 0 : i32
    %22 = arith.cmpi ne, %21, %c0_i32 : i32
    scf.if %22 {
      %23 = tpu.iota {dimensions = array<i32: 0>} : vector<32x1xi32>
      %24 = vector.broadcast %13 : i32 to vector<32x1xi32>
      %25 = arith.addi %24, %23 : vector<32x1xi32>
      %26 = tpu.iota {dimensions = array<i32: 1>} : vector<1x256xi32>
      %27 = vector.broadcast %11 : i32 to vector<32x1xi32>
      %28 = arith.cmpi sge, %25, %27 : vector<32x1xi32>
      %c3_i32_9 = arith.constant 3 : i32
      %29 = arith.addi %11, %c3_i32_9 : i32
      %30 = vector.broadcast %29 : i32 to vector<32x1xi32>
      %31 = arith.cmpi slt, %25, %30 : vector<32x1xi32>
      %32 = arith.andi %28, %31 : vector<32x1xi1>
      %33 = vector.broadcast %12 : i32 to vector<1x256xi32>
      %34 = arith.cmpi sge, %26, %33 : vector<1x256xi32>
      %c3_i32_10 = arith.constant 3 : i32
      %35 = arith.addi %12, %c3_i32_10 : i32
      %36 = vector.broadcast %35 : i32 to vector<1x256xi32>
      %37 = arith.cmpi slt, %26, %36 : vector<1x256xi32>
      %38 = arith.andi %34, %37 : vector<1x256xi1>
      %39 = vector.broadcast %32 : vector<32x1xi1> to vector<32x256xi1>
      %40 = vector.broadcast %38 : vector<1x256xi1> to vector<32x256xi1>
      %41 = arith.andi %39, %40 : vector<32x256xi1>
      %42 = arith.extui %41 : vector<32x256xi1> to vector<32x256xi32>
      %43 = arith.sitofp %42 : vector<32x256xi32> to vector<32x256xf32>
      %cst_11 = arith.constant 5.000000e-01 : f32
      %44 = vector.broadcast %cst_11 : f32 to vector<32x256xf32>
      %45 = arith.mulf %43, %44 : vector<32x256xf32>
      %46 = arith.addf %4, %45 : vector<32x256xf32>
      %cst_12 = arith.constant 0.000000e+00 : f32
      %cst_13 = arith.constant 1.000000e+00 : f32
      %47 = vector.broadcast %cst_12 : f32 to vector<32x256xf32>
      %48 = arith.maximumf %47, %46 : vector<32x256xf32>
      %49 = vector.broadcast %cst_13 : f32 to vector<32x256xf32>
      %50 = arith.minimumf %49, %48 : vector<32x256xf32>
      %c0_14 = arith.constant 0 : index
      %c0_15 = arith.constant 0 : index
      %51 = vector.load %arg4[%c0_14, %c0_15] : memref<32x256xf32, #tpu.memory_space<vmem>>, vector<32x256xf32>
      tpu.vector_store %arg4[%c0_14, %c0_15], %50 {strides = array<i32>} : memref<32x256xf32, #tpu.memory_space<vmem>>, vector<32x256xf32>,
    } else {
    }
    return
  }
  func.func @transform_0(%arg0: i32) -> i32 {
    %c0_i32 = arith.constant 0 : i32
    %c0_i32_0 = arith.constant 0 : i32
    return %c0_i32 : i32
  }
  func.func @transform_1(%arg0: i32) -> (i32, i32) {
    %c0_i32 = arith.constant 0 : i32
    %c0_i32_0 = arith.constant 0 : i32
    return %arg0, %c0_i32 : i32, i32
  }
  func.func @transform_2(%arg0: i32) -> (i32, i32) {
    %c0_i32 = arith.constant 0 : i32
    %c0_i32_0 = arith.constant 0 : i32
    return %arg0, %c0_i32 : i32, i32
  }
  func.func @transform_3(%arg0: i32) -> (i32, i32) {
    %c0_i32 = arith.constant 0 : i32
    %c0_i32_0 = arith.constant 0 : i32
    return %arg0, %c0_i32 : i32, i32
  }
}

</mosaic_0001>

<bundles_post_ra>
// kernel: noise_injection.1
= control target key start
LH: loop header
LB: loop body
LE: loop exit
PB: predicated region body
PF: predicated region fallthrough
CT: control target
= control target key end

     0   :  { %8 = vsyncpa [#allocation5], 0  ;;  %s1205_s0 = inlined_call_operand.vmem [shape: s32[3], index: 0, kind: input, shape index: {}]   ;;  %s1206_s1 = inlined_call_operand.hbm [shape: f32[64,256], index: 1, kind: input, shape index: {}]   ;;  %s1207_s2 = inlined_call_operand.hbm [shape: f32[64,256], index: 2, kind: input, shape index: {}]   ;;  %s1208_s3 = inlined_call_operand.hbm [shape: f32[64,256], index: 3, kind: output, shape index: {}]  }
   0x1   :  { %9 = vsyncpa [#allocation3], 0 }
   0x2   :  { %11 = vsyncpa [#allocation3 + $0x1], 0 }
   0x3   :  { %12 = vsyncpa [#allocation8], 0 }
   0x4   :  { %14 = vsyncpa [#allocation8 + $0x1], 0 }
   0x5   :  { %15 = vsyncpa [#allocation4], 0 }
   0x6   :  { %17 = vsyncpa [#allocation4 + $0x1], 0  ;;  %s841_s12 = smov 0   ;;  %s843_s13 = smov 0  }
   0x7   :  { %s845_s14 = smov 0   ;;  %s847_s15 = smov 0  }
   0x8 LB: > { %s862_s16 = sadd.s32 4294967295, %s810_s15   ;;  %s554_s17 = sadd.s32 4294967294, %s810_s15   ;;  %s810_s15 = sphi %s847_s15, %s1232_s15   ;;  %s806_s14 = sphi %s845_s14, %s1231_s14   ;;  %s802_s13 = sphi %s843_s13, %s1230_s13   ;;  %s798_s12 = sphi %s841_s12, %s1229_s12  }
   0x9   : > { %s866_s18 = sadd.s32 1, %s810_s15   ;;  %s51_s19 = sadd.s32 1, %s806_s14 }
   0xa   : > { %s48_s20 = ssub.s32 %s810_s15, %s866_s18  ;;  %p58_p0 = scmp.ne.s32.totalorder %s806_s14, %s802_s13 }
   0xb   : > { %p49_p1 = scmp.eq.s32.totalorder %s48_s20, 0  ;;  %p59_p2 = scmp.eq.s32.totalorder %s810_s15, 0 }
   0xc   : > { %p64_p3 = scmp.ne.s32.totalorder %s802_s13, %s798_s12  ;;  %p1209_p4 = scmp.eq.s32.totalorder %s862_s16, 0 }
   0xd   : > { %s878_s21 = scalar_select %p49_p1, %s806_s14, %s51_s19  }
   0xe   : > { %p880_p5 = por %p59_p2, %p58_p0  ;;  %p886_p6 = por %p1209_p4, %p64_p3 }
   0xf   : > { %p114_p7 = scmp.eq.s32.totalorder %s862_s16, 1  ;;  %p120_p8 = scmp.eq.s32.totalorder %s554_s17, 1 }
  0x10   : > { %s1213_s23 = scalar_select %p886_p6, 1, 0 }
  0x11   : > { %p555_p9 = scmp.ge.s32.totalorder %s810_s15, 1  ;;  %p127_p10 = scmp.lt.s32.totalorder %s810_s15, 3 }
  0x12   : > { %p893_p11 = por %p114_p7, %p58_p0  ;;  %p897_p12 = por %p120_p8, %p64_p3 }
  0x13   : > { %p901_p13 = pnand %p555_p9, %p127_p10  ;;  %s140_s29 = sshll.u32 %s1205_s0, 4  ;;  %s141_s29 = int_to_ptr.vmem [resolvable:$true] %s140_s29 }
  0x14   : > { %s1214_s24 = scalar_select %p893_p11, 1, 0 }
  0x15   : > { %s1215_s25 = scalar_select %p897_p12, 1, 0 }
  0x16   : > { %p604_p1 = pneg %p901_p13  ;;  %p620_p2 = scmp.lt.s32.totalorder %s810_s15, 2 }
  0x17   : > { %s919_s4 = sand.u32 1, %s806_s14   ;;  %s661_s7 = scalar_lea.vmem %s141_s29, 16 }
  0x18   : > { %p914_p7 = pnand %p604_p1, %p1209_p4  ;;  %p923_p3 = pnand %p620_p2, %p880_p5 }
  0x19   : > { %s558_s6 = sshll.u32 %s919_s4, 6  ;;  %p662_p8 = scmp.ne.s32.totalorder %s141_s29, %s661_s7 }
  0x1a   : > { %p663_p9 = pneg %p914_p7  ;;  %p669_p1 = scmp.lt.s32.totalorder %s141_s29, %s141_s29 }
  0x1b   : > { %p670_p4 = scmp.lt.s32.totalorder %s661_s7, %s661_s7 }
  0x1c   : > { %p664_p10 = pnand %p663_p9, %p662_p8 }
  0x1d   : > { %p671_p12 = por %p670_p4, %p669_p1 }
  0x1e   : > { %p665_p0 = pneg %p664_p10 }
  0x20   : > { %p672_p11 = pnand %p671_p12, %p665_p0 }
  0x22   : > { %675 = shalt.err (!%p672_p11)
}
  0x23   : > { %s812_s8 = smov [#allocation2]   ;;  %s589_s9 = sshll.u32 %s810_s15, 10 }
  0x24   : > { %607 = dma.vmem_to_smem (!%p914_p7), %s141_s29, 16, %s812_s8, [#allocation5]  }
  0x25   : > { %s155_s10 = scalar_lea.vmem [#allocation6], %s558_s6  ;;  %s940_s20 = scalar_lea.hbm %s1206_s1, %s589_s9 }
  0x26   : > { %s163_s11 = sshll.u32 %s155_s10, 4  ;;  %s152_s22 = scalar_lea.sflag [#allocation3], %s919_s4  ;;  %s942_s11 = int_to_ptr.vmem [resolvable:$true] %s163_s11 }
  0x27   : > { %s676_s27 = scalar_lea.hbm %s940_s20, 1024  ;;  %p678_p5 = pneg %p923_p3 }
  0x28   : > { %p677_p4 = scmp.ne.s32.totalorder %s940_s20, %s676_s27  ;;  %s681_s30 = scalar_lea.hbm %s1206_s1, 2048 }
  0x29   : > { %p682_p0 = scmp.lt.u32.totalorder %s940_s20, %s1206_s1  ;;  %p683_p2 = scmp.lt.u32.totalorder %s681_s30, %s676_s27 }
  0x2a   : > { %p679_p11 = pnand %p678_p5, %p677_p4  ;;  %p685_p8 = scmp.lt.u32.totalorder %s676_s27, %s940_s20 }
  0x2b   : > { %p684_p7 = por %p683_p2, %p682_p0 }
  0x2c   : > { %p680_p12 = pneg %p679_p11 }
  0x2d   : > { %p686_p9 = por %p685_p8, %p684_p7 }
  0x2f   : > { %p687_p10 = pnand %p686_p9, %p680_p12 }
  0x31   : > { %690 = shalt.err (!%p687_p10)
}
  0x32   : > { %s691_s10 = scalar_lea.vmem %s942_s11, 1024  ;;  %s813_s17 = smov [#allocation6]  }
  0x33   : > { %p692_p1 = scmp.ne.s32.totalorder %s942_s11, %s691_s10  ;;  %s696_s19 = sshll.u32 %s813_s17, 4  ;;  %s697_s19 = int_to_ptr.vmem [resolvable:$false] %s696_s19 }
  0x34   : > { %s698_s28 = scalar_lea.vmem %s697_s19, 2048  ;;  %p699_p6 = scmp.lt.s32.totalorder %s942_s11, %s697_s19 }
  0x35   : > { %p694_p4 = pnand %p692_p1, %p678_p5  ;;  %p700_p0 = scmp.lt.s32.totalorder %s698_s28, %s691_s10 }
  0x37   : > { %p695_p11 = pneg %p694_p4  ;;  %p701_p2 = por %p700_p0, %p699_p6 }
  0x39   : > { %p702_p7 = pnand %p701_p2, %p695_p11 }
  0x3b   : > { %705 = shalt.err (!%p702_p7)
}
  0x3c   : > { %s814_s27 = smov 256   ;;  %s815_s29 = smov 16  }
  0x3d   : > { %611 = dma.hbm_to_vmem [thread:$0]  (!%p923_p3), %s940_s20, 1024, %s942_s11, %s152_s22, %s814_s27, %s814_s27, %s815_s29  }
  0x3e   : > { %s980_s8 = scalar_lea.hbm %s1207_s2, %s589_s9  ;;  %s177_s10 = scalar_lea.vmem [#allocation7], %s558_s6 }
  0x3f   : > { %s185_s17 = sshll.u32 %s177_s10, 4  ;;  %s174_s19 = scalar_lea.sflag [#allocation8], %s919_s4  ;;  %s984_s17 = int_to_ptr.vmem [resolvable:$true] %s185_s17 }
  0x40   : > { %s706_s28 = scalar_lea.hbm %s980_s8, 1024  ;;  %s711_s9 = scalar_lea.hbm %s1207_s2, 2048 }
  0x41   : > { %p707_p6 = scmp.ne.s32.totalorder %s980_s8, %s706_s28  ;;  %p712_p9 = scmp.lt.u32.totalorder %s980_s8, %s1207_s2 }
  0x42   : > { %p713_p10 = scmp.lt.u32.totalorder %s711_s9, %s706_s28  ;;  %p715_p4 = scmp.lt.u32.totalorder %s706_s28, %s980_s8 }
  0x43   : > { %p709_p12 = pnand %p707_p6, %p678_p5 }
  0x44   : > { %p714_p1 = por %p713_p10, %p712_p9 }
  0x45   : > { %p710_p8 = pneg %p709_p12 }
  0x46   : > { %p716_p11 = por %p715_p4, %p714_p1 }
  0x48   : > { %p717_p0 = pnand %p716_p11, %p710_p8 }
  0x4a   : > { %720 = shalt.err (!%p717_p0)
}
  0x4b   : > { %s721_s6 = scalar_lea.vmem %s984_s17, 1024  ;;  %s816_s7 = smov [#allocation7]  }
  0x4c   : > { %p722_p2 = scmp.ne.s32.totalorder %s984_s17, %s721_s6  ;;  %s726_s10 = sshll.u32 %s816_s7, 4  ;;  %s727_s10 = int_to_ptr.vmem [resolvable:$false] %s726_s10 }
  0x4d   : > { %s728_s11 = scalar_lea.vmem %s727_s10, 2048  ;;  %p729_p12 = scmp.lt.s32.totalorder %s984_s17, %s727_s10 }
  0x4e   : > { %p724_p7 = pnand %p722_p2, %p678_p5  ;;  %p730_p9 = scmp.lt.s32.totalorder %s728_s11, %s721_s6 }
  0x50   : > { %p725_p6 = pneg %p724_p7  ;;  %p731_p10 = por %p730_p9, %p729_p12 }
  0x52   : > { %p732_p1 = pnand %p731_p10, %p725_p6 }
  0x54   : > { %735 = shalt.err (!%p732_p1)
}
  0x55   : > { %614 = dma.hbm_to_vmem [thread:$0]  (!%p923_p3), %s980_s8, 1024, %s984_s17, %s174_s19, %s814_s27, %s814_s27, %s815_s29  }
  0x56   : > { %197 = sbr.rel (%p901_p13) target bundleno = 172 (0xac), region = 32  ;;  %p1219_p5 = scmp.eq.s32.totalorder (!%p901_p13), %s862_s16, 0 }
  0x5d   : > { %781 = dma.done.wait (%p1219_p5), [#allocation5], 16   ;;  %p1220_p8 = pmov %p1219_p5 }
  0x5e   : > { %s1022_s5 = sand.u32 1, %s802_s13   ;;  %p1221_p3 = scmp.ne.s32.totalorder %s1213_s23, 0 }
  0x5f   : > { %783 = vsyncadd (%p1220_p8), [#allocation5], 4294967280  ;;  %s1025_s28 = sshll.u32 %s1022_s5, 6  ;;  %s204_s4 = scalar_lea.sflag [#allocation3], %s1022_s5 }
  0x60   : > { %s1029_s27 = scalar_lea.vmem [#allocation6], %s1025_s28 }
  0x61   : > { %785 = dma.done.wait (%p1221_p3), %s204_s4, 1024  }
  0x62   : > { %787 = vsyncadd (%p1221_p3), %s204_s4, 4294966272  ;;  %s213_s26 = scalar_lea.sflag [#allocation8], %s1022_s5  ;;  %s1037_s29 = scalar_lea.vmem [#allocation7], %s1025_s28 }
  0x63   : > { %789 = dma.done.wait (%p1221_p3), %s213_s26, 1024  }
  0x64   : > { %791 = vsyncadd (%p1221_p3), %s213_s26, 4294966272 }
  0x65   : > { %221 = sfence }
  0x66   : > { %v248_v0 = vld [vmem:[%s1029_s27] sm:$0xff]  ;;  %v249_v2 = vld [vmem:[%s1029_s27 + $0x8] sm:$0xff]  ;;  %s1046_s8 = sld [smem:[#allocation2]]  ;;  %v250_v5 = vld [vmem:[%s1029_s27 + $0x10] sm:$0xff]  ;;  %s1073_s23 = sld [smem:[#allocation2 + $0x1]] }
  0x67   : > { %v256_v1 = vld [vmem:[%s1037_s29] sm:$0xff]  ;;  %v257_v4 = vld [vmem:[%s1037_s29 + $0x8] sm:$0xff]  ;;  %v258_v6 = vld [vmem:[%s1037_s29 + $0x10] sm:$0xff]  ;;  %s1076_s17 = sshll.u32 %s862_s16, 5  ;;  %s1084_s19 = sld [smem:[#allocation2 + $0x2]] }
  0x68   : > { %v264_v3 = vmul.f32 0.05, %v256_v1  ;;  %v265_v7 = vmul.f32 0.05, %v257_v4  ;;  %v266_v8 = vmul.f32 0.05, %v258_v6 }
  0x69   : > { %v251_v9 = vld [vmem:[%s1029_s27 + $0x18] sm:$0xff]  ;;  %v252_v13 = vld [vmem:[%s1029_s27 + $0x20] sm:$0xff]  ;;  %v253_v15 = vld [vmem:[%s1029_s27 + $0x28] sm:$0xff]  ;;  %s1088_s20 = scalar_lea.vmem [#allocation9], %s1025_s28  ;;  %s309_s9 = sadd.s32 32, %s1076_s17 }
  0x6a   : > { %v259_v10 = vld [vmem:[%s1037_s29 + $0x18] sm:$0xff]  ;;  %v1053_v11 = vadd.f32 %v264_v3, %v248_v0  ;;  %v260_v14 = vld [vmem:[%s1037_s29 + $0x20] sm:$0xff]  ;;  %v1058_v16 = vadd.f32 %v265_v7, %v249_v2  ;;  %v1060_v17 = vadd.f32 %v266_v8, %v250_v5  ;;  %v261_v19 = vld [vmem:[%s1037_s29 + $0x28] sm:$0xff] }
  0x6b   : > { %v267_v12 = vmul.f32 0.05, %v259_v10  ;;  %v268_v18 = vmul.f32 0.05, %v260_v14  ;;  %v254_v20 = vld [vmem:[%s1029_s27 + $0x30] sm:$0xff]  ;;  %v263_v29 = vld [vmem:[%s1037_s29 + $0x38] sm:$0xff] }
  0x6c   : > { %v262_v21 = vld [vmem:[%s1037_s29 + $0x30] sm:$0xff]  ;;  %v280_v22 = vmax.f32 %v1053_v11, 0.0  ;;  %v269_v24 = vmul.f32 0.05, %v261_v19  ;;  %v281_v26 = vmax.f32 %v1058_v16, 0.0  ;;  %v282_v27 = vmax.f32 %v1060_v17, 0.0  ;;  %p310_p4 = scmp.lt.s32.totalorder %s1073_s23, %s309_s9 }
  0x6d   : > { %v1066_v23 = vadd.f32 %v267_v12, %v251_v9  ;;  %v270_v25 = vmul.f32 0.05, %v262_v21  ;;  %v1070_v28 = vadd.f32 %v268_v18, %v252_v13  ;;  %v255_v34 = vld [vmem:[%s1029_s27 + $0x38] sm:$0xff]  ;;  %v271_v38 = vmul.f32 0.05, %v263_v29  ;;  %p308_p13 = scmp.eq.s32.totalorder %s1046_s8, 1 }
  0x6e   : > { %v288_v30 = vmin.f32 %v280_v22, 1.0  ;;  %v1079_v32 = vadd.f32 %v269_v24, %v253_v15  ;;  %v289_v35 = vmin.f32 %v281_v26, 1.0  ;;  %v290_v36 = vmin.f32 %v282_v27, 1.0  ;;  %s313_s22 = sadd.s32 3, %s1073_s23 }
  0x6f   : > { %v283_v31 = vmax.f32 %v1066_v23, 0.0  ;;  %v1081_v33 = vadd.f32 %v270_v25, %v254_v20  ;;  %v284_v37 = vmax.f32 %v1070_v28, 0.0  ;;  %v1096_v43 = vadd.f32 %v271_v38, %v255_v34  ;;  %p311_p11 = pnand %p310_p4, %p308_p13  ;;  %p314_p0 = scmp.gt.s32.totalorder %s313_s22, %s1076_s17 }
  0x70   : > { %296 = vst [vmem:[%s1088_s20] sm:$0xff] %v288_v30  ;;  %v285_v40 = vmax.f32 %v1079_v32, 0.0  ;;  %297 = vst [vmem:[%s1088_s20 + $0x8] sm:$0xff] %v289_v35 }
  0x71   : > { %v291_v39 = vmin.f32 %v283_v31, 1.0  ;;  %v286_v41 = vmax.f32 %v1081_v33, 0.0  ;;  %298 = vst [vmem:[%s1088_s20 + $0x10] sm:$0xff] %v290_v36  ;;  %v292_v42 = vmin.f32 %v284_v37, 1.0  ;;  %v287_v46 = vmax.f32 %v1096_v43, 0.0  ;;  %p312_p2 = pneg %p311_p11 }
  0x72   : > { %v293_v44 = vmin.f32 %v285_v40, 1.0 }
  0x73   : > { %299 = vst [vmem:[%s1088_s20 + $0x18] sm:$0xff] %v291_v39  ;;  %v294_v45 = vmin.f32 %v286_v41, 1.0  ;;  %300 = vst [vmem:[%s1088_s20 + $0x20] sm:$0xff] %v292_v42  ;;  %v295_v47 = vmin.f32 %v287_v46, 1.0  ;;  %p315_p7 = pnand %p314_p0, %p312_p2 }
  0x74   : > { %301 = vst [vmem:[%s1088_s20 + $0x28] sm:$0xff] %v293_v44  ;;  %v319_v48 = vlaneseq (!%p315_p7)  ;;  %s349_s30 = sadd.s32 (!%p315_p7), 3, %s1084_s19  ;;  %v324_v49 = vstv (!%p315_p7), %s1076_s17  ;;  %v346_v50 = vstv (!%p315_p7), %s1084_s19  ;;  %v332_v54 = vstv (!%p315_p7), %s1073_s23 }
  0x75   : > { %302 = vst [vmem:[%s1088_s20 + $0x30] sm:$0xff] %v294_v45  ;;  %303 = vst [vmem:[%s1088_s20 + $0x38] sm:$0xff] %v295_v47  ;;  %318 = sbr.rel (%p315_p7) target bundleno = 146 (0x92), region = 48  ;;  %v350_v51 = vstv (!%p315_p7), %s349_s30  ;;  %v337_v55 = vstv (!%p315_p7), %s313_s22  ;;  %v817_v0 = vmov (!%p315_p7), 0.0  }
  0x76   : > { %v320_v52 = vshrl.u32 (!%p315_p7), %v319_v48, 7  ;;  %v330_v53 = vand.u32 (!%p315_p7), 127, %v319_v48 }
  0x78   : > { %v325_v56 = vadd.s32 (!%p315_p7), %v324_v49, %v320_v52  ;;  %vm347_vm0 = vcmp.ge.s32.totalorder (!%p315_p7), %v330_v53, %v346_v50  ;;  %vm351_vm1 = vcmp.lt.s32.totalorder (!%p315_p7), %v330_v53, %v350_v51  ;;  %v331_v57 = vadd.s32 (!%p315_p7), 128, %v330_v53 }
  0x79   : > { %vm1112_vm2 = vmand (!%p315_p7), %vm347_vm0, %vm351_vm1  ;;  %v321_v59 = vadd.s32 (!%p315_p7), 8, %v320_v52  ;;  %v322_v60 = vadd.s32 (!%p315_p7), 16, %v320_v52  ;;  %v323_v61 = vadd.s32 (!%p315_p7), 24, %v320_v52 }
  0x7a   : > { %vm333_vm3 = vcmp.ge.s32.totalorder (!%p315_p7), %v325_v56, %v332_v54  ;;  %vm338_vm4 = vcmp.lt.s32.totalorder (!%p315_p7), %v325_v56, %v337_v55  ;;  %vm348_vm5 = vcmp.ge.s32.totalorder (!%p315_p7), %v331_v57, %v346_v50  ;;  %vm352_vm6 = vcmp.lt.s32.totalorder (!%p315_p7), %v331_v57, %v350_v51 }
  0x7b   : > { %vm342_vm7 = vmand (!%p315_p7), %vm333_vm3, %vm338_vm4  ;;  %v326_v62 = vadd.s32 (!%p315_p7), %v324_v49, %v321_v59  ;;  %v327_v63 = vadd.s32 (!%p315_p7), %v324_v49, %v322_v60  ;;  %v328_v3 = vadd.s32 (!%p315_p7), %v324_v49, %v323_v61 }
  0x7c   : > { %vm367_vm8 = vmand %vm342_vm7, %vm1112_vm2 }
  0x7d   : > { %v574_v1 = vsel %vm367_vm8, 1.0, %v817_v0  ;;  %vm1118_vm9 = vmand %vm348_vm5, %vm352_vm6  ;;  %vm334_vm10 = vcmp.ge.s32.totalorder %v326_v62, %v332_v54  ;;  %vm339_vm11 = vcmp.lt.s32.totalorder %v326_v62, %v337_v55  ;;  %vm335_vm14 = vcmp.ge.s32.totalorder %v327_v63, %v332_v54 }
  0x7e   : > { %v391_v4 = vmul.f32 0.5, %v574_v1  ;;  %vm368_vm12 = vmand %vm342_vm7, %vm1118_vm9  ;;  %vm340_vm15 = vcmp.lt.s32.totalorder %v327_v63, %v337_v55  ;;  %vm336_vm3 = vcmp.ge.s32.totalorder %v328_v3, %v332_v54  ;;  %vm341_vm4 = vcmp.lt.s32.totalorder %v328_v3, %v337_v55 }
  0x7f   : > { %v575_v5 = vsel %vm368_vm12, 1.0, %v817_v0  ;;  %vm343_vm13 = vmand %vm334_vm10, %vm339_vm11 }
  0x80   : > { %v399_v6 = vadd.f32 %v391_v4, %v1053_v11  ;;  %v392_v7 = vmul.f32 0.5, %v575_v5  ;;  %vm369_vm0 = vmand %vm343_vm13, %vm1112_vm2 }
  0x81   : > { %v576_v8 = vsel %vm369_vm0, 1.0, %v817_v0  ;;  %vm370_vm1 = vmand %vm343_vm13, %vm1118_vm9 }
  0x82   : > { %v407_v9 = vmax.f32 %v399_v6, 0.0  ;;  %v400_v10 = vadd.f32 %v392_v7, %v1058_v16  ;;  %v393_v12 = vmul.f32 0.5, %v576_v8  ;;  %v577_v13 = vsel %vm370_vm1, 1.0, %v817_v0  ;;  %vm344_vm5 = vmand %vm335_vm14, %vm340_vm15 }
  0x83   : > { %v394_v14 = vmul.f32 0.5, %v577_v13  ;;  %vm371_vm6 = vmand %vm344_vm5, %vm1112_vm2 }
  0x84   : > { %v415_v11 = vmin.f32 %v407_v9, 1.0  ;;  %v408_v15 = vmax.f32 %v400_v10, 0.0  ;;  %v401_v18 = vadd.f32 %v393_v12, %v1060_v17  ;;  %v578_v19 = vsel %vm371_vm6, 1.0, %v817_v0  ;;  %vm372_vm7 = vmand %vm344_vm5, %vm1118_vm9 }
  0x85   : > { %v402_v20 = vadd.f32 %v394_v14, %v1066_v23  ;;  %v395_v21 = vmul.f32 0.5, %v578_v19  ;;  %v579_v16 = vsel %vm372_vm7, 1.0, %v817_v0  ;;  %vm345_vm8 = vmand %vm336_vm3, %vm341_vm4 }
  0x86   : > { %423 = vst [vmem:[%s1088_s20] sm:$0xff] %v415_v11  ;;  %v416_v22 = vmin.f32 %v408_v15, 1.0  ;;  %v409_v24 = vmax.f32 %v401_v18, 0.0  ;;  %v396_v25 = vmul.f32 0.5, %v579_v16  ;;  %vm373_vm10 = vmand %vm345_vm8, %vm1112_vm2 }
  0x87   : > { %v410_v17 = vmax.f32 %v402_v20, 0.0  ;;  %v403_v26 = vadd.f32 %v395_v21, %v1070_v28  ;;  %v580_v27 = vsel %vm373_vm10, 1.0, %v817_v0  ;;  %vm374_vm11 = vmand %vm345_vm8, %vm1118_vm9 }
  0x88   : > { %424 = vst [vmem:[%s1088_s20 + $0x8] sm:$0xff] %v416_v22  ;;  %v417_v23 = vmin.f32 %v409_v24, 1.0  ;;  %v404_v29 = vadd.f32 %v396_v25, %v1079_v32  ;;  %v397_v30 = vmul.f32 0.5, %v580_v27  ;;  %v581_v31 = vsel %vm374_vm11, 1.0, %v817_v0 }
  0x89   : > { %v418_v34 = vmin.f32 %v410_v17, 1.0  ;;  %v411_v35 = vmax.f32 %v403_v26, 0.0  ;;  %v398_v36 = vmul.f32 0.5, %v581_v31 }
  0x8a   : > { %425 = vst [vmem:[%s1088_s20 + $0x10] sm:$0xff] %v417_v23  ;;  %v412_v37 = vmax.f32 %v404_v29, 0.0  ;;  %v405_v28 = vadd.f32 %v397_v30, %v1081_v33 }
  0x8b   : > { %426 = vst [vmem:[%s1088_s20 + $0x18] sm:$0xff] %v418_v34  ;;  %v419_v38 = vmin.f32 %v411_v35, 1.0  ;;  %v406_v39 = vadd.f32 %v398_v36, %v1096_v43 }
  0x8c   : > { %v420_v40 = vmin.f32 %v412_v37, 1.0  ;;  %v413_v41 = vmax.f32 %v405_v28, 0.0 }
  0x8d   : > { %427 = vst [vmem:[%s1088_s20 + $0x20] sm:$0xff] %v419_v38  ;;  %v414_v32 = vmax.f32 %v406_v39, 0.0 }
  0x8e   : > { %428 = vst [vmem:[%s1088_s20 + $0x28] sm:$0xff] %v420_v40  ;;  %v421_v42 = vmin.f32 %v413_v41, 1.0 }
  0x8f   : > { %v422_v44 = vmin.f32 %v414_v32, 1.0 }
  0x90   : > { %429 = vst [vmem:[%s1088_s20 + $0x30] sm:$0xff] %v421_v42 }
  0x91   : > { %430 = vst [vmem:[%s1088_s20 + $0x38] sm:$0xff] %v422_v44 }
  0x92 PF: > { %s593_s6 = sshll.u32 %s862_s16, 10  ;;  %s446_s28 = sshll.u32 %s1088_s20, 4  ;;  %s1161_s28 = int_to_ptr.vmem [resolvable:$true] %s446_s28 }
  0x93   : > { %s1158_s11 = scalar_lea.hbm %s1208_s3, %s593_s6  ;;  %s432_s4 = scalar_lea.sflag [#allocation4], %s1022_s5 }
  0x94   : > { %s736_s27 = scalar_lea.vmem %s1161_s28, 1024  ;;  %p1226_p12 = scmp.ne.s32.totalorder %s1214_s24, 0 }
  0x95   : > { %p737_p6 = scmp.ne.s32.totalorder %s1161_s28, %s736_s27  ;;  %s818_s26 = smov [#allocation9]  }
  0x96   : > { %s740_s29 = sshll.u32 %s818_s26, 4  ;;  %s741_s29 = int_to_ptr.vmem [resolvable:$false] %s740_s29 }
  0x97   : > { %p738_p9 = pnand %p737_p6, %p1226_p12  ;;  %s742_s16 = scalar_lea.vmem %s741_s29, 2048 }
  0x98   : > { %p743_p1 = scmp.lt.s32.totalorder %s1161_s28, %s741_s29  ;;  %p744_p5 = scmp.lt.s32.totalorder %s742_s16, %s736_s27 }
  0x99   : > { %p739_p10 = pneg %p738_p9 }
  0x9a   : > { %p745_p8 = por %p744_p5, %p743_p1 }
  0x9c   : > { %p746_p3 = pnand %p745_p8, %p739_p10 }
  0x9e   : > { %749 = shalt.err (!%p746_p3)
}
  0x9f   : > { %s750_s8 = scalar_lea.hbm %s1158_s11, 1024  ;;  %s754_s19 = scalar_lea.hbm %s1208_s3, 2048 }
  0xa0   : > { %p751_p13 = scmp.ne.s32.totalorder %s1158_s11, %s750_s8  ;;  %p755_p0 = scmp.lt.u32.totalorder %s1158_s11, %s1208_s3 }
  0xa1   : > { %p756_p2 = scmp.lt.u32.totalorder %s754_s19, %s750_s8  ;;  %p758_p6 = scmp.lt.u32.totalorder %s750_s8, %s1158_s11 }
  0xa2   : > { %p752_p4 = pnand %p751_p13, %p1226_p12 }
  0xa3   : > { %p757_p7 = por %p756_p2, %p755_p0 }
  0xa4   : > { %p753_p11 = pneg %p752_p4 }
  0xa5   : > { %p759_p9 = por %p758_p6, %p757_p7 }
  0xa7   : > { %p760_p10 = pnand %p759_p9, %p753_p11 }
  0xa9   : > { %763 = shalt.err (!%p760_p10)
}
  0xaa   : > { %s819_s22 = smov 256   ;;  %s820_s30 = smov 16  }
  0xab   : > { %602 = dma.vmem_to_hbm [thread:$0]  (%p1226_p12), %s1161_s28, 1024, %s1158_s11, %s432_s4, %s819_s22, %s819_s22, %s820_s30  }
  0xac PF: > { %s461_s6 = sand.u32 1, %s798_s12   ;;  %p1227_p1 = scmp.ne.s32.totalorder %s1215_s25, 0 }
  0xad   : > { %p1228_p5 = scmp.ge.s32.totalorder %s810_s15, 2  ;;  %s462_s7 = scalar_lea.sflag [#allocation4], %s461_s6 }
  0xaf   : > { %p616_p8 = pnand %p1228_p5, %p1227_p1 }
  0xb1   : > { %793 = dma.done.wait (!%p616_p8), %s462_s7, 1024  }
  0xb2   : > { %795 = vsyncadd (!%p616_p8), %s462_s7, 4294966272  ;;  %p20_p3 = scmp.ge.s32.totalorder %s866_s18, 4   ;;  %s1229_s12 = smov %s802_s13 }
  0xb3   : > { %s1230_s13 = smov %s806_s14  ;;  %s1231_s14 = smov %s878_s21 }
  0xb4   : > { %s1232_s15 = smov %s866_s18  ;;  %22 = sbr.rel (!%p20_p3) target bundleno = 8 (0x8), region = 99 }
  0xbb   :  { %467 = vsyncpa [#allocation3], 1 }
  0xbc   :  { %469 = vsyncpa [#allocation3 + $0x1], 1 }
  0xbd   :  { %470 = vsyncpa [#allocation8], 1 }
  0xbe   :  { %472 = vsyncpa [#allocation8 + $0x1], 1 }
  0xbf   :  { %473 = vsyncpa [#allocation4], 1 }
  0xc0   :  { %475 = vsyncpa [#allocation4 + $0x1], 1 }
  0xc1   :  { %476 = vsyncpa [#allocation5], 1 }
  0xc2   :  { %478 = vsyncpa [#allocation5 + $0x1], 1 }

</bundles_post_ra>
